<compile_context>
chip_gen: v7x
topology: tpu7x:2x2x1
jax: 0.10.0
libtpu: 0.0.40
codegen_flags: <defaults>
</compile_context>

<pallas_src>
import jax
import jax.numpy as jnp
from jax import lax
from jax.experimental import pallas as pl
from jax.experimental.pallas import tpu as pltpu

_MIB = 1024 * 1024


# ---------------------------------------------------------------------------
# Kernels
# ---------------------------------------------------------------------------
def _masked_num_den(x, m):
    """num [tn, d] f32 via MXU batched matvec; den [tn, 1] f32 (no +eps yet)."""
    mq = m.astype(x.dtype)[:, None, :]                              # [tn, 1, tl]
    num = jnp.einsum(
        "nql,nld->nqd", mq, x,
        preferred_element_type=jnp.float32,
        precision=lax.Precision.HIGHEST,
    )                                                               # [tn, 1, d]
    den = jnp.sum(m.astype(jnp.float32), axis=1, keepdims=True)     # [tn, 1]
    return num[:, 0, :], den


def _avg_pool_full_kernel(x_ref, m_ref, out_ref):
    """Single pass: whole sequence in one block (1-D grid over batch tiles)."""
    seq_len = m_ref.shape[1]
    num, den = _masked_num_den(x_ref[...], m_ref[...])
    den = den + jnp.float32(seq_len * 1e-8)
    out_ref[...] = (num * pl.reciprocal(den, approx=True)).astype(out_ref.dtype)


def _avg_pool_stream_kernel(x_ref, m_ref, out_ref, den_acc):
    """Streamed reduction over L tiles; grid = (batch tiles, L tiles)."""
    l = pl.program_id(1)
    tl = m_ref.shape[1]

    @pl.when(l == 0)
    def _init():
        out_ref[...] = jnp.zeros_like(out_ref)
        den_acc[...] = jnp.zeros_like(den_acc)

    num, den = _masked_num_den(x_ref[...], m_ref[...])
    out_ref[...] += num                    # out block is VMEM-resident over l
    den_acc[...] += den + jnp.float32(tl * 1e-8)

    @pl.when(l == pl.num_programs(1) - 1)
    def _finalize():
        out_ref[...] *= pl.reciprocal(den_acc[...], approx=True)


# ---------------------------------------------------------------------------
# VMEM-budget-driven tile selection
# ---------------------------------------------------------------------------
def _round_up(v, m):
    return -(-v // m) * m


def _vmem_tile_bytes(tn, tl, d, x_itemsize):
    """Estimated VMEM footprint of one grid step (double-buffered blocks)."""
    d_pad = _round_up(d, 128)
    x_blk = tn * _round_up(tl, 8) * d_pad * x_itemsize        # [tn, tl, d]
    m_blk = _round_up(tn, 8) * _round_up(tl, 128) * 4         # [tn, tl] f32
    o_blk = _round_up(tn, 8) * d_pad * 4                      # [tn, d] f32
    den = _round_up(tn, 8) * 128 * 4                          # [tn, 1] scratch
    return 2 * (x_blk + m_blk + o_blk) + den


def _vmem_capacity_bytes():
    try:
        return int(pltpu.get_tpu_info().vmem_capacity_bytes)
    except Exception:
        return 64 * _MIB   # conservative fallback (v7x per-TC size)


def _choose_tiles(N, L, d, x_itemsize, budget, l_tile_cap=None):
    # Batch-tile candidates: multiple-of-8 divisors of N (or N itself).
    tn_all = [t for t in range(8, N + 1, 8) if N % t == 0] or [N]
    # Keep >= 2 batch tiles when N allows it (v7x dual-TC / megacore sharding).
    tn_cap = N if N < 16 else N // 2
    tn_cands = sorted([t for t in tn_all if t <= tn_cap] or [min(tn_all)],
                      reverse=True)
    # Sequence-tile candidates: full L (fast path) or multiple-of-128 divisors
    # (mask lane-dim and x sublane-dim tiling constraints).
    tl_cands = [L] + [t for t in range(128, L, 128) if L % t == 0]
    if l_tile_cap is not None:
        tl_cands = [t for t in tl_cands if t <= l_tile_cap] or [min(tl_cands)]
    tl_cands = sorted(set(tl_cands), reverse=True)

    for tl in tl_cands:            # prefer the longest streamed L tile ...
        for tn in tn_cands:        # ... then the biggest batch tile that fits.
            if _vmem_tile_bytes(tn, tl, d, x_itemsize) <= budget:
                return tn, tl
    # Nothing fits the soft budget: smallest tiles; caller raises vmem limit.
    # TODO(synk): for extreme (L, d) with no 128-multiple divisor of L this may
    # still exceed physical VMEM; would need padded/masked ragged L tiles.
    return min(tn_cands), min(tl_cands)


# ---------------------------------------------------------------------------
# Public wrapper
# ---------------------------------------------------------------------------
def average_pooler(x, mask, *, l_tile_cap=None):
    """Masked average pool. x: [N, L, d]; mask: [N, L] (0/1). Returns [N, d] f32."""
    N, L, d = x.shape
    assert mask.shape == (N, L), (mask.shape, (N, L))
    m2d = mask.astype(jnp.float32)

    cap = _vmem_capacity_bytes()
    soft_limit = min(cap - 16 * _MIB, 100 * _MIB)
    budget = int(soft_limit * 0.8)
    tn, tl = _choose_tiles(N, L, d, x.dtype.itemsize, budget, l_tile_cap)
    need = _vmem_tile_bytes(tn, tl, d, x.dtype.itemsize)
    vmem_limit = int(min(cap - 8 * _MIB, max(soft_limit, need + 16 * _MIB)))

    out_shape = jax.ShapeDtypeStruct((N, d), jnp.float32)

    if tl == L:
        # Fast path: whole sequence per block, 1-D grid over batch tiles.
        return pl.pallas_call(
            _avg_pool_full_kernel,
            out_shape=out_shape,
            grid_spec=pltpu.PrefetchScalarGridSpec(
                num_scalar_prefetch=0,
                grid=(N // tn,),
                in_specs=[
                    pl.BlockSpec((tn, L, d), lambda n: (n, 0, 0)),
                    pl.BlockSpec((tn, L), lambda n: (n, 0)),
                ],
                out_specs=pl.BlockSpec((tn, d), lambda n: (n, 0)),
            ),
            compiler_params=pltpu.CompilerParams(
                dimension_semantics=("parallel",),
                vmem_limit_bytes=vmem_limit),
        )(x, m2d)

    # Streamed path: reduction over L tiles on the trailing "arbitrary" axis.
    return pl.pallas_call(
        _avg_pool_stream_kernel,
        out_shape=out_shape,
        grid_spec=pltpu.PrefetchScalarGridSpec(
            num_scalar_prefetch=0,
            grid=(N // tn, L // tl),
            in_specs=[
                pl.BlockSpec((tn, tl, d), lambda n, l: (n, l, 0)),
                pl.BlockSpec((tn, tl), lambda n, l: (n, l)),
            ],
            out_specs=pl.BlockSpec((tn, d), lambda n, l: (n, 0)),
            scratch_shapes=[pltpu.VMEM((tn, 1), jnp.float32)],
        ),
        compiler_params=pltpu.CompilerParams(
            dimension_semantics=("parallel", "arbitrary"),
            vmem_limit_bytes=vmem_limit),
    )(x, m2d)


if __name__ == "__main__":
    key = jax.random.PRNGKey(0)
    kx, km, kx2, km2 = jax.random.split(key, 4)

    # --- Fast path: full-L single pass (1-D grid over batch tiles). ---
    N, L, d = 8, 16, 256
    x = jax.random.normal(kx, (N, L, d), jnp.float32)
    mask = (jax.random.uniform(km, (N, L)) > 0.3).astype(jnp.float32)
    out = average_pooler(x, mask)
    jax.block_until_ready(out)
    assert out.shape == (N, d), out.shape

    # Pure-JAX reference mirroring the PyTorch forward exactly.
    m_exp = mask[..., None] * jnp.ones_like(x)
    ref = (x * m_exp).sum(axis=1) / (m_exp + 1e-8).sum(axis=1)
    # Tolerance has margin for the approx (EUP) reciprocal (~1e-7 rel).
    assert jnp.allclose(out, ref, atol=1e-4, rtol=1e-4), \
        float(jnp.abs(out - ref).max())

    # --- Streamed path: force L tiling to exercise the accumulating kernel. ---
    N2, L2, d2 = 8, 256, 256
    x2 = jax.random.normal(kx2, (N2, L2, d2), jnp.float32)
    mask2 = (jax.random.uniform(km2, (N2, L2)) > 0.5).astype(jnp.float32)
    out2 = average_pooler(x2, mask2, l_tile_cap=128)   # grid = (1, 2)
    jax.block_until_ready(out2)
    m_exp2 = mask2[..., None] * jnp.ones_like(x2)
    ref2 = (x2 * m_exp2).sum(axis=1) / (m_exp2 + 1e-8).sum(axis=1)
    assert jnp.allclose(out2, ref2, atol=1e-4, rtol=1e-4), \
        float(jnp.abs(out2 - ref2).max())

    print("KERNEL_OK")
</pallas_src>

<mosaic_0001>
module attributes {stable_mosaic.version = 11 : i64} {
  func.func @_avg_pool_full_kernel(%arg0: i32, %arg1: memref<8x16x256xf32, #tpu.memory_space<vmem>>, %arg2: memref<8x16xf32, #tpu.memory_space<vmem>>, %arg3: memref<8x256xf32, #tpu.memory_space<vmem>>) attributes {dimension_semantics = [#tpu.dimension_semantics<parallel>], iteration_bounds = array<i64: 1>, scalar_prefetch = 0 : i64, scratch_operands = 0 : i64, tpu.core_type = #tpu.core_type<tc>, window_params = [{transform_indices = @transform_0, window_bounds = array<i64: 8, 16, 256>}, {transform_indices = @transform_1, window_bounds = array<i64: 8, 16>}, {transform_indices = @transform_2, window_bounds = array<i64: 8, 256>}]} {
    %c0 = arith.constant 0 : index
    %c0_0 = arith.constant 0 : index
    %c0_1 = arith.constant 0 : index
    %0 = vector.load %arg1[%c0, %c0_0, %c0_1] : memref<8x16x256xf32, #tpu.memory_space<vmem>>, vector<8x16x256xf32>
    %c0_2 = arith.constant 0 : index
    %c0_3 = arith.constant 0 : index
    %1 = vector.load %arg2[%c0_2, %c0_3] : memref<8x16xf32, #tpu.memory_space<vmem>>, vector<8x16xf32>
    %2 = vector.shape_cast %1 : vector<8x16xf32> to vector<8x1x16xf32>
    "tpu.trace_start"() <{level = 10 : i32, message = "nql,nld->nqd"}> : () -> ()
    %cst = arith.constant dense<0.000000e+00> : vector<8x1x256xf32>
    %3 = tpu.matmul %2, %0, %cst {dimension_numbers = #tpu.dot_dimension_numbers<[2], [1], [1], [2], [0, 0, 0, 1, 1, 2], [0], [0]>, precision = #tpu.contract_precision<fp32>} : vector<8x1x16xf32>, vector<8x16x256xf32>, vector<8x1x256xf32> -> vector<8x1x256xf32>
    "tpu.trace_stop"() : () -> ()
    %cst_4 = arith.constant dense<0.000000e+00> : vector<8xf32>
    %4 = vector.multi_reduction <add>, %1, %cst_4 [1] : vector<8x16xf32> to vector<8xf32>
    %5 = vector.shape_cast %4 : vector<8xf32> to vector<8x1xf32>
    %6 = vector.shape_cast %3 : vector<8x1x256xf32> to vector<8x256xf32>
    %cst_5 = arith.constant 1.600000e-07 : f32
    %7 = vector.broadcast %cst_5 : f32 to vector<8x1xf32>
    %8 = arith.addf %5, %7 : vector<8x1xf32>
    %9 = tpu.reciprocal %8 {approx = true} : vector<8x1xf32> -> vector<8x1xf32>
    %10 = vector.broadcast %9 : vector<8x1xf32> to vector<8x256xf32>
    %11 = arith.mulf %6, %10 : vector<8x256xf32>
    %c0_6 = arith.constant 0 : index
    %c0_7 = arith.constant 0 : index
    %12 = vector.load %arg3[%c0_6, %c0_7] : memref<8x256xf32, #tpu.memory_space<vmem>>, vector<8x256xf32>
    tpu.vector_store %arg3[%c0_6, %c0_7], %11 {strides = array<i32>} : memref<8x256xf32, #tpu.memory_space<vmem>>, vector<8x256xf32>,
    return
  }
  func.func @transform_0(%arg0: i32) -> (i32, i32, i32) {
    %c0_i32 = arith.constant 0 : i32
    %c0_i32_0 = arith.constant 0 : i32
    %c0_i32_1 = arith.constant 0 : i32
    return %arg0, %c0_i32, %c0_i32_0 : i32, i32, i32
  }
  func.func @transform_1(%arg0: i32) -> (i32, i32) {
    %c0_i32 = arith.constant 0 : i32
    %c0_i32_0 = arith.constant 0 : i32
    return %arg0, %c0_i32 : i32, i32
  }
  func.func @transform_2(%arg0: i32) -> (i32, i32) {
    %c0_i32 = arith.constant 0 : i32
    %c0_i32_0 = arith.constant 0 : i32
    return %arg0, %c0_i32 : i32, i32
  }
}

</mosaic_0001>

<bundles_post_ra>
// kernel: tpu_custom_call.1
= control target key start
LH: loop header
LB: loop body
LE: loop exit
PB: predicated region body
PF: predicated region fallthrough
CT: control target
= control target key end

     0   :  { %7 = vsyncpa [#allocation3], 0  ;;  %s5235_s0 = inlined_call_operand.hbm [shape: f32[8,16,256], index: 0, kind: input, shape index: {}]   ;;  %s5236_s1 = inlined_call_operand.hbm [shape: f32[8,16], index: 1, kind: input, shape index: {}]   ;;  %s5237_s2 = inlined_call_operand.hbm [shape: f32[8,256], index: 2, kind: output, shape index: {}]  }
   0x1   :  { %8 = vsyncpa [#allocation6], 0 }
   0x2   :  { %9 = vsyncpa [#allocation4], 0  ;;  %s4528_s9 = smov [#allocation2]   ;;  %s4456_s13 = scalar_lea.hbm %s5235_s0, 4096 }
   0x3   :  { %s15_s10 = sshll.u32 %s4528_s9, 4  ;;  %p4457_p0 = scmp.ne.s32.totalorder %s5235_s0, %s4456_s13  ;;  %s16_s10 = int_to_ptr.vmem [resolvable:$true] %s15_s10 }
   0x4   :  { %p4460_p1 = scmp.lt.u32.totalorder %s4456_s13, %s5235_s0 }
   0x6   :  { %p4462_p2 = pnand %p4460_p1, %p4457_p0 }
   0x8   :  { %4465 = shalt.err (!%p4462_p2)
}
   0x9   :  { %s4466_s18 = scalar_lea.vmem %s16_s10, 4096  ;;  %p4471_p4 = scmp.lt.s32.totalorder %s16_s10, %s16_s10 }
   0xa   :  { %p4467_p3 = scmp.ne.s32.totalorder %s16_s10, %s4466_s18  ;;  %p4472_p5 = scmp.lt.s32.totalorder %s4466_s18, %s4466_s18 }
   0xc   :  { %p4473_p6 = por %p4472_p5, %p4471_p4 }
   0xe   :  { %p4474_p7 = pnand %p4473_p6, %p4467_p3 }
  0x10   :  { %4477 = shalt.err (!%p4474_p7)
}
  0x11   :  { %s4529_s19 = smov 256   ;;  %s4530_s20 = smov 16  }
  0x12   :  { %21 = dma.hbm_to_vmem [thread:$0]  %s5235_s0, 4096, %s16_s10, [#allocation3], %s4529_s19, %s4529_s19, %s4530_s20  }
  0x13   :  { %s4531_s23 = smov [#allocation5]   ;;  %s4478_s27 = scalar_lea.hbm %s5236_s1, 128 }
  0x14   :  { %s28_s24 = sshll.u32 %s4531_s23, 4  ;;  %p4479_p8 = scmp.ne.s32.totalorder %s5236_s1, %s4478_s27  ;;  %s29_s24 = int_to_ptr.vmem [resolvable:$true] %s28_s24 }
  0x15   :  { %p4482_p9 = scmp.lt.u32.totalorder %s4478_s27, %s5236_s1 }
  0x17   :  { %p4484_p10 = pnand %p4482_p9, %p4479_p8 }
  0x19   :  { %4487 = shalt.err (!%p4484_p10)
}
  0x1a   :  { %s4488_s4 = scalar_lea.vmem %s29_s24, 128  ;;  %p4493_p12 = scmp.lt.s32.totalorder %s29_s24, %s29_s24 }
  0x1b   :  { %p4489_p11 = scmp.ne.s32.totalorder %s29_s24, %s4488_s4  ;;  %p4494_p13 = scmp.lt.s32.totalorder %s4488_s4, %s4488_s4 }
  0x1d   :  { %p4495_p0 = por %p4494_p13, %p4493_p12 }
  0x1f   :  { %p4496_p1 = pnand %p4495_p0, %p4489_p11 }
  0x21   :  { %4499 = shalt.err (!%p4496_p1)
}
  0x22   :  { %31 = dma.hbm_to_vmem [thread:$0]  %s5236_s1, 128, %s29_s24, [#allocation6]  }
  0x23   :  { %4522 = dma.done.wait [#allocation3], 4096  }
  0x24   :  { %4523 = vsyncadd [#allocation3], 4294963200 }
  0x25   :  { %4524 = dma.done.wait [#allocation6], 128  }
  0x26   :  { %4525 = vsyncadd [#allocation6], 4294967168  ;;  %v4532_v0 = vmov 0.0   ;;  %v4533_v1 = vmov 1966171168   ;;  %v76_v3 = vlaneseq  ;;  %v39_v6 = vld [vmem:[#allocation2 + $0x8] sm:$0xff] }
  0x27   :  { %192 = vmatprep.mubr.f32.mxu0 %v4532_v0  ;;  %v74_v2 = vunpack.c.l.s4 %v4533_v1  ;;  %685 = vmatprep.mubr.f32.mxu1 %v4532_v0  ;;  %v41_v7 = vld [vmem:[#allocation2 + $0x18] sm:$0xff]  ;;  %v38_v8 = vld [vmem:[#allocation2] sm:$0xff]  ;;  %v124_v9 = vand.u32 4294901760, %v39_v6  ;;  %v40_v11 = vld [vmem:[#allocation2 + $0x10] sm:$0xff]  ;;  %vm121_vm0 = vcmask 130048   ;;  %vm4120_vm1 = vcmask 1041409  }
  0x28   :  { %v77_v5 = vshrl.u32 %v76_v3, 7  ;;  %v128_v10 = vand.u32 4294901760, %v41_v7  ;;  %v126_v12 = vand.u32 4294901760, %v38_v8  ;;  %v43_v13 = vld [vmem:[#allocation2 + $0x28] sm:$0xff]  ;;  %v45_v14 = vld [vmem:[#allocation2 + $0x38] sm:$0xff]  ;;  %v130_v15 = vand.u32 4294901760, %v40_v11 }
  0x29   :  { %v75_v4 = vunpack.c.0.s8 %v74_v2  ;;  %v617_v16 = vand.u32 4294901760, %v43_v13  ;;  %v621_v17 = vand.u32 4294901760, %v45_v14  ;;  %v42_v18 = vld [vmem:[#allocation2 + $0x20] sm:$0xff]  ;;  %v44_v19 = vld [vmem:[#allocation2 + $0x30] sm:$0xff]  ;;  %v4580_v22 = vsub.f32 %v39_v6, %v124_v9  ;;  %s4534_s1 = smov [#allocation7]  }
  0x2a   :  { %v4578_v21 = vpack.c.bf16 %v128_v10, %v124_v9  ;;  %v4582_v23 = vsub.f32 %v41_v7, %v128_v10  ;;  %v4584_v24 = vsub.f32 %v38_v8, %v126_v12  ;;  %v4586_v25 = vld [vmem:[#allocation5] sm:$0xff]  ;;  %v4588_v26 = vpack.c.bf16 %v130_v15, %v126_v12  ;;  %s4164_s6 = sshll.u32 %s4534_s1, 4  ;;  %s4165_s6 = int_to_ptr.vmem [resolvable:$true] %s4164_s6 }
  0x2b   :  { %v4576_v20 = vsub.s32 %v75_v4, %v77_v5  ;;  %v4590_v27 = vsub.f32 %v40_v11, %v130_v15  ;;  %v4592_v28 = vpack.c.bf16 %v621_v17, %v617_v16  ;;  %v4595_v29 = vsub.f32 %v43_v13, %v617_v16  ;;  %s4500_s7 = scalar_lea.vmem %s4165_s6, 256  ;;  %p4505_p3 = scmp.lt.s32.totalorder %s4165_s6, %s4165_s6 }
  0x2c   :  { %4175 = vmatprep.subr.bf16.mxu0 %v4578_v21  ;;  %v4597_v30 = vsub.f32 %v45_v14, %v621_v17  ;;  %v619_v31 = vand.u32 4294901760, %v42_v18  ;;  %v623_v32 = vand.u32 4294901760, %v44_v19  ;;  %v206_v34 = vand.u32 4294901760, %v4580_v22  ;;  %p4501_p2 = scmp.ne.s32.totalorder %s4165_s6, %s4500_s7  ;;  %p4506_p4 = scmp.lt.s32.totalorder %s4500_s7, %s4500_s7 }
  0x2d   :  { %4177 = vmatpush1.bf16.msra.mxu0 %v4588_v26  ;;  %4199 = vmatprep.subr.bf16.mxu1 %v4592_v28  ;;  %v79_v33 = vrot.slane %v4586_v25, %v4576_v20  ;;  %v218_v35 = vand.u32 4294901760, %v4582_v23  ;;  %v212_v36 = vand.u32 4294901760, %v4584_v24  ;;  %v224_v39 = vand.u32 4294901760, %v4590_v27 }
  0x2e   :  { %v4606_v37 = vpack.c.bf16 %v623_v32, %v619_v31  ;;  %v4608_v38 = vsub.f32 %v42_v18, %v619_v31  ;;  %v4611_v40 = vsub.f32 %v44_v19, %v623_v32  ;;  %v207_v42 = vsub.f32 %v4580_v22, %v206_v34  ;;  %p4507_p5 = por %p4506_p4, %p4505_p3 }
  0x2f   :  { %v4614_v41 = vrot.slane %v79_v33, %v4576_v20  ;;  %v219_v43 = vsub.f32 %v4582_v23, %v218_v35  ;;  %v213_v44 = vsub.f32 %v4584_v24, %v212_v36  ;;  %v699_v45 = vand.u32 4294901760, %v4595_v29 }
  0x30   :  { %4201 = vmatpush1.bf16.msra.mxu1 %v4606_v37  ;;  %v711_v46 = vand.u32 4294901760, %v4597_v30  ;;  %v87_v47 = vcombine.high %v79_v33, %v79_v33  ;;  %v208_v49 = vand.u32 4294901760, %v207_v42  ;;  %v225_v51 = vsub.f32 %v4590_v27, %v224_v39  ;;  %v47_v33 = vld [vmem:[#allocation2 + $0x48] sm:$0xff]  ;;  %v49_v42 = vld [vmem:[#allocation2 + $0x58] sm:$0xff]  ;;  %p4508_p6 = pnand %p4507_p5, %p4501_p2 }
  0x31   :  { %v122_v48 = vsel %vm121_vm0, %v4614_v41, 0  ;;  %v220_v50 = vand.u32 4294901760, %v219_v43  ;;  %v700_v53 = vsub.f32 %v4595_v29, %v699_v45  ;;  %v705_v57 = vand.u32 4294901760, %v4608_v38 }
  0x32   :  { %v4633_v52 = vand.u32 4294901760, %v122_v48  ;;  %v712_v55 = vsub.f32 %v4597_v30, %v711_v46  ;;  %v4642_v56 = vrot.slane %v87_v47, %v4576_v20  ;;  %v214_v59 = vand.u32 4294901760, %v213_v44  ;;  %v4703_v47 = vld [vmem:[#allocation2 + $0x50] sm:$0xff] }
  0x33   :  { %v4178_v54 = vpack.c.bf16 %v220_v50, %v208_v49  ;;  %v701_v60 = vand.u32 4294901760, %v700_v53  ;;  %v717_v61 = vand.u32 4294901760, %v4611_v40  ;;  %v226_v62 = vand.u32 4294901760, %v225_v51  ;;  %v53_v49 = vld [vmem:[#allocation2 + $0x78] sm:$0xff]  ;;  %v4719_v53 = vld [vmem:[#allocation2 + $0x70] sm:$0xff] }
  0x34   :  { %v4646_v58 = vsub.f32 %v122_v48, %v4633_v52  ;;  %v713_v63 = vand.u32 4294901760, %v712_v55  ;;  %v615_v1 = vsel %vm121_vm0, %v4642_v56, 0  ;;  %v706_v2 = vsub.f32 %v4608_v38, %v705_v57  ;;  %v51_v48 = vld [vmem:[#allocation2 + $0x68] sm:$0xff] }
  0x35   :  { %4179 = vmatprep.subr.bf16.mxu0 %v4178_v54  ;;  %v4655_v4 = vand.u32 4294901760, %v615_v1  ;;  %v718_v5 = vsub.f32 %v4611_v40, %v717_v61  ;;  %v4180_v9 = vpack.c.bf16 %v226_v62, %v214_v59  ;;  %v4182_v14 = vpack.c.bf16 %v4582_v23, %v4580_v22 }
  0x36   :  { %v195_v3 = vand.u32 4294901760, %v4646_v58  ;;  %v4202_v6 = vpack.c.bf16 %v713_v63, %v701_v60  ;;  %v707_v10 = vand.u32 4294901760, %v706_v2  ;;  %v4206_v18 = vpack.c.bf16 %v4597_v30, %v4595_v29  ;;  %v4712_v30 = vld [vmem:[#allocation2 + $0x60] sm:$0xff] }
  0x37   :  { %v4664_v8 = vsub.f32 %v615_v1, %v4655_v4  ;;  %v719_v11 = vand.u32 4294901760, %v718_v5  ;;  %v4184_v19 = vpack.c.bf16 %v4590_v27, %v4584_v24  ;;  %v4208_v31 = vpack.c.bf16 %v4611_v40, %v4608_v38 }
  0x38   :  { %v196_v7 = vsub.f32 %v4646_v58, %v195_v3  ;;  %4203 = vmatprep.subr.bf16.mxu1 %v4202_v6  ;;  %v4190_v32 = vpack.c.bf16 %v218_v35, %v206_v34  ;;  %v72_v43 = vcombine.high %v4586_v25, %v4586_v25  ;;  %v117_v44 = vcombine.high %v4614_v41, %v4614_v41  ;;  %v4701_v35 = vld [vmem:[#allocation2 + $0x40] sm:$0xff] }
  0x39   :  { %v688_v13 = vand.u32 4294901760, %v4664_v8  ;;  %v4204_v16 = vpack.c.bf16 %v719_v11, %v707_v10  ;;  %v4214_v22 = vpack.c.bf16 %v711_v46, %v699_v45  ;;  %v1110_v23 = vand.u32 4294901760, %v47_v33 }
  0x3a   :  { %v197_v12 = vand.u32 4294901760, %v196_v7  ;;  %v1114_v34 = vand.u32 4294901760, %v49_v42  ;;  %v119_v41 = vcombine.high %v4642_v56, %v4642_v56  ;;  %v4192_v29 = vpack.c.bf16 %v224_v39, %v212_v36 }
  0x3b   :  { %v689_v15 = vsub.f32 %v4664_v8, %v688_v13  ;;  %v86_v45 = vrot.slane %v72_v43, %v4576_v20  ;;  %v1112_v46 = vand.u32 4294901760, %v4701_v35  ;;  %v1116_v50 = vand.u32 4294901760, %v4703_v47 }
  0x3c   :  { %198 = vmatmul.mubr.f32.vlgmr.msra.gmra.mrb[0].mxu0 %v197_v12  ;;  %v1603_v51 = vand.u32 4294901760, %v51_v48  ;;  %v1108_v24 = vsel %vm121_vm0, %v117_v44, 0  ;;  %v4722_v27 = vsub.f32 %v47_v33, %v1110_v23  ;;  %v4724_v36 = vsub.f32 %v49_v42, %v1114_v34 }
  0x3d   :  { %4181 = vmatpush1.bf16.msra.mxu0 %v4180_v9  ;;  %288 = vmatprep.mubr.f32.mxu0 %v4532_v0  ;;  %v690_v17 = vand.u32 4294901760, %v689_v15  ;;  %v1607_v39 = vand.u32 4294901760, %v53_v49  ;;  %v4727_v54 = vrot.slane %v86_v45, %v4576_v20  ;;  %v4216_v55 = vpack.c.bf16 %v717_v61, %v705_v57 }
  0x3e   :  { %4183 = vmatprep.subr.bf16.mxu0 %v4182_v14  ;;  %v1605_v56 = vand.u32 4294901760, %v4712_v30  ;;  %v1609_v59 = vand.u32 4294901760, %v4719_v53  ;;  %v4737_v60 = vand.u32 4294901760, %v1108_v24  ;;  %v88_v63 = vcombine.high %v86_v45, %v86_v45 }
  0x3f   :  { %691 = vmatmul.mubr.f32.vlgmr.msra.gmra.mrb[0].mxu1 %v690_v17  ;;  %v4741_v62 = vsel %vm121_vm0, %v4727_v54, 0  ;;  %v4745_v38 = vsub.f32 %v4701_v35, %v1112_v46  ;;  %v4748_v40 = vsub.f32 %v4703_v47, %v1116_v50  ;;  %v4750_v57 = vsub.f32 %v51_v48, %v1603_v51 }
  0x40   :  { %4205 = vmatpush1.bf16.msra.mxu1 %v4204_v16  ;;  %781 = vmatprep.mubr.f32.mxu1 %v4532_v0  ;;  %v4754_v61 = vsub.f32 %v53_v49, %v1607_v39  ;;  %v1192_v1 = vand.u32 4294901760, %v4722_v27  ;;  %v1204_v2 = vand.u32 4294901760, %v4724_v36  ;;  %v4761_v5 = vpack.c.bf16 %v1114_v34, %v1110_v23 }
  0x41   :  { %4207 = vmatprep.subr.bf16.mxu1 %v4206_v18  ;;  %v4768_v6 = vsub.f32 %v4712_v30, %v1605_v56  ;;  %v1210_v10 = vand.u32 4294901760, %v4748_v40  ;;  %v1685_v11 = vand.u32 4294901760, %v4750_v57  ;;  %v4066_v15 = vsel %vm121_vm0, %v4586_v25, 0.0 }
  0x42   :  { %v1193_v12 = vsub.f32 %v4722_v27, %v1192_v1  ;;  %v1697_v14 = vand.u32 4294901760, %v4754_v61  ;;  %4067 = vadd.xlane.f32.xlu0 %v4066_v15  ;;  %v4799_v16 = vpack.c.bf16 %v1607_v39, %v1603_v51  ;;  %v4823_v43 = vpack.c.bf16 %v1116_v50, %v1112_v46 }
  0x43   :  { %v1211_v25 = vsub.f32 %v4748_v40, %v1210_v10  ;;  %vm4123_vm2 = vcmask 1042434   ;;  %vm4126_vm3 = vcmask 1043459   ;;  %vm4129_vm4 = vcmask 1044484  }
  0x44   :  { %290 = vmatmul.mubr.f32.vlgmr.msra.gmra.mrb[0].mxu0 %v4633_v52  ;;  %v1698_v42 = vsub.f32 %v4754_v61, %v1697_v14  ;;  %vm4132_vm5 = vcmask 1045509   ;;  %vm4135_vm6 = vcmask 1046534   ;;  %vm4138_vm7 = vcmask 1047559  }
  0x45   :  { %4185 = vmatpush1.bf16.msra.mxu0 %v4184_v19  ;;  %368 = vmatprep.mubr.f32.mxu0 %v4532_v0  ;;  %v1691_v19 = vand.u32 4294901760, %v4768_v6  ;;  %v1212_v34 = vand.u32 4294901760, %v1211_v25 }
  0x46   :  { %4187 = vmatprep.subr.bf16.mxu0 %v4578_v21 }
  0x47   :  { %783 = vmatmul.mubr.f32.vlgmr.msra.gmra.mrb[0].mxu1 %v4655_v4  ;;  %v1692_v35 = vsub.f32 %v4768_v6, %v1691_v19 }
  0x48   :  { %4209 = vmatpush1.bf16.msra.mxu1 %v4208_v31  ;;  %861 = vmatprep.mubr.f32.mxu1 %v4532_v0 }
  0x49   :  { %4211 = vmatprep.subr.bf16.mxu1 %v4592_v28  ;;  %v1693_v51 = vand.u32 4294901760, %v1692_v35 }
  0x4c   :  { %371 = vmatmul.mubr.f32.vlgmr.msra.gmra.mrb[0].mxu0 %v4646_v58  ;;  %v1601_v58 = vsel %vm121_vm0, %v119_v41, 0  ;;  %v1699_v41 = vand.u32 4294901760, %v1698_v42  ;;  %v4906_v42 = vld [vmem:[#allocation2 + $0xb0] sm:$0xff] }
  0x4d   :  { %4189 = vmatpush1.bf16.msra.mxu0 %v4588_v26  ;;  %445 = vmatprep.mubr.f32.mxu0 %v4532_v0  ;;  %v4773_v7 = vand.u32 4294901760, %v1601_v58 }
  0x4e   :  { %4191 = vmatprep.subr.bf16.mxu0 %v4190_v32  ;;  %v1194_v32 = vand.u32 4294901760, %v1193_v12  ;;  %v57_v12 = vld [vmem:[#allocation2 + $0x98] sm:$0xff] }
  0x4f   :  { %864 = vmatmul.mubr.f32.vlgmr.msra.gmra.mrb[0].mxu1 %v4664_v8  ;;  %v1198_v8 = vand.u32 4294901760, %v4745_v38  ;;  %v4803_v17 = vsub.f32 %v1601_v58, %v4773_v7  ;;  %v4238_v58 = vpack.c.bf16 %v1204_v2, %v1192_v1  ;;  %v59_v1 = vld [vmem:[#allocation2 + $0xa8] sm:$0xff] }
  0x50   :  { %4213 = vmatpush1.bf16.msra.mxu1 %v4606_v37  ;;  %938 = vmatprep.mubr.f32.mxu1 %v4532_v0 }
  0x51   :  { %4215 = vmatprep.subr.bf16.mxu1 %v4214_v22  ;;  %v1199_v18 = vsub.f32 %v4745_v38, %v1198_v8  ;;  %v1674_v22 = vand.u32 4294901760, %v4803_v17  ;;  %v4240_v25 = vpack.c.bf16 %v1210_v10, %v1198_v8 }
  0x53   :  { %v1200_v23 = vand.u32 4294901760, %v1199_v18  ;;  %v1675_v46 = vsub.f32 %v4803_v17, %v1674_v22  ;;  %v2100_v18 = vand.u32 4294901760, %v57_v12 }
  0x54   :  { %449 = vmatmul.mubr.f32.vlgmr.msra.gmra.mrb[0].mxu0 %v195_v3  ;;  %v4759_v3 = vrot.slane %v88_v63, %v4576_v20  ;;  %v4783_v20 = vsub.f32 %v4719_v53, %v1609_v59  ;;  %v4230_v53 = vpack.c.bf16 %v4724_v36, %v4722_v27  ;;  %v4890_v27 = vld [vmem:[#allocation2 + $0x80] sm:$0xff] }
  0x55   :  { %4193 = vmatpush1.bf16.msra.mxu0 %v4192_v29  ;;  %531 = vmatprep.mubr.f32.mxu0 %v4532_v0  ;;  %v4845_v29 = vpack.c.bf16 %v1609_v59, %v1605_v56  ;;  %v4228_v50 = vpack.c.bf16 %v1212_v34, %v1200_v23  ;;  %v4254_v59 = vpack.c.bf16 %v4754_v61, %v4750_v57 }
  0x56   :  { %4195 = vmatprep.subr.bf16.mxu0 %v4578_v21  ;;  %v4771_v21 = vsub.f32 %v1108_v24, %v4737_v60  ;;  %v4777_v9 = vsel %vm121_vm0, %v4759_v3, 0  ;;  %v1703_v31 = vand.u32 4294901760, %v4783_v20  ;;  %v120_v39 = vcombine.high %v4759_v3, %v4759_v3  ;;  %v55_v3 = vld [vmem:[#allocation2 + $0x88] sm:$0xff] }
  0x57   :  { %942 = vmatmul.mubr.f32.vlgmr.msra.gmra.mrb[0].mxu1 %v688_v13  ;;  %v1205_v13 = vsub.f32 %v4724_v36, %v1204_v2  ;;  %v4256_v63 = vpack.c.bf16 %v4783_v20, %v4768_v6  ;;  %v2096_v15 = vand.u32 4294901760, %v55_v3  ;;  %v56_v36 = vld [vmem:[#allocation2 + $0x90] sm:$0xff]  ;;  %v61_v2 = vld [vmem:[#allocation2 + $0xb8] sm:$0xff]  ;;  %v4941_v34 = vand.u32 4294901760, %v4777_v9 }
  0x58   :  { %4217 = vmatpush1.bf16.msra.mxu1 %v4216_v55  ;;  %1024 = vmatprep.mubr.f32.mxu1 %v4532_v0  ;;  %v1704_v47 = vsub.f32 %v4783_v20, %v1703_v31  ;;  %v4862_v56 = vsel %vm121_vm0, %v120_v39, 0  ;;  %v2102_v61 = vand.u32 4294901760, %v56_v36 }
  0x59   :  { %4219 = vmatprep.subr.bf16.mxu1 %v4592_v28  ;;  %v1181_v28 = vand.u32 4294901760, %v4771_v21  ;;  %v1206_v33 = vand.u32 4294901760, %v1205_v13  ;;  %v4262_v13 = vpack.c.bf16 %v1697_v14, %v1685_v11  ;;  %v4902_v14 = vsub.f32 %v57_v12, %v2100_v18 }
  0x5a   :  { %v1705_v24 = vand.u32 4294901760, %v1704_v47  ;;  %v4921_v10 = vsub.f32 %v56_v36, %v2102_v61 }
  0x5b   :  { %v1182_v44 = vsub.f32 %v4771_v21, %v1181_v28  ;;  %v4226_v48 = vpack.c.bf16 %v1206_v33, %v1194_v32  ;;  %v2589_v32 = vand.u32 4294901760, %v59_v1  ;;  %v2593_v33 = vand.u32 4294901760, %v61_v2 }
  0x5c   :  { %533 = vmatmul.mubr.f32.vlgmr.msra.gmra.mrb[0].mxu0 %v4633_v52  ;;  %v4252_v55 = vpack.c.bf16 %v1705_v24, %v1693_v51 }
  0x5d   :  { %4197 = vmatpush1.bf16.msra.mxu0 %v4588_v26  ;;  %607 = vmatprep.mubr.f32.mxu0 %v4532_v0  ;;  %v1686_v26 = vsub.f32 %v4750_v57, %v1685_v11  ;;  %v1183_v45 = vand.u32 4294901760, %v1182_v44  ;;  %v2098_v57 = vand.u32 4294901760, %v4890_v27  ;;  %v4900_v11 = vsub.f32 %v55_v3, %v2096_v15 }
  0x5e   :  { %4223 = vmatprep.subr.bf16.mxu0 %v4761_v5  ;;  %v4926_v6 = vsub.f32 %v59_v1, %v2589_v32  ;;  %v4928_v20 = vsub.f32 %v61_v2, %v2593_v33 }
  0x5f   :  { %1026 = vmatmul.mubr.f32.vlgmr.msra.gmra.mrb[0].mxu1 %v4655_v4  ;;  %v1687_v49 = vand.u32 4294901760, %v1686_v26  ;;  %v4904_v26 = vld [vmem:[#allocation2 + $0xa0] sm:$0xff]  ;;  %v4919_v8 = vsub.f32 %v4890_v27, %v2098_v57  ;;  %v4278_v2 = vpack.c.bf16 %v4902_v14, %v4900_v11 }
  0x60   :  { %4221 = vmatpush1.bf16.msra.mxu1 %v4606_v37  ;;  %1100 = vmatprep.mubr.f32.mxu1 %v4532_v0  ;;  %v118_v37 = vcombine.high %v4727_v54, %v4727_v54  ;;  %v1676_v54 = vand.u32 4294901760, %v1675_v46  ;;  %v2591_v44 = vand.u32 4294901760, %v4904_v26 }
  0x61   :  { %4247 = vmatprep.subr.bf16.mxu1 %v4799_v16  ;;  %v4250_v30 = vpack.c.bf16 %v1699_v41, %v1687_v49  ;;  %v2683_v49 = vand.u32 4294901760, %v4928_v20  ;;  %v4962_v41 = vpack.c.bf16 %v2593_v33, %v2589_v32  ;;  %v63_v33 = vld [vmem:[#allocation2 + $0xc8] sm:$0xff] }
  0x64   :  { %609 = vmatmul.mubr.f32.vlgmr.msra.gmra.mrb[0].mxu0 %v4633_v52  ;;  %v4853_v52 = vsel %vm121_vm0, %v118_v37, 0 }
  0x65   :  { %4225 = vmatpush1.bf16.msra.mxu0 %v4823_v43  ;;  %1178 = vmatprep.mubr.f32.mxu0 %v4532_v0 }
  0x66   :  { %4227 = vmatprep.subr.bf16.mxu0 %v4226_v48  ;;  %v2671_v48 = vand.u32 4294901760, %v4926_v6 }
  0x67   :  { %1102 = vmatmul.mubr.f32.vlgmr.msra.gmra.mrb[0].mxu1 %v4655_v4  ;;  %v4232_v4 = vpack.c.bf16 %v4748_v40, %v4745_v38  ;;  %v4264_v38 = vpack.c.bf16 %v1703_v31, %v1691_v19  ;;  %v4915_v40 = vand.u32 4294901760, %v4741_v62  ;;  %v2190_v19 = vand.u32 4294901760, %v4902_v14 }
  0x68   :  { %1184 = vmatmul.mubr.f32.vlgmr.msra.gmra.mrb[2].mxu0 %v1183_v45  ;;  %4249 = vmatpush1.bf16.msra.mxu1 %v4845_v29  ;;  %v4934_v31 = vpack.c.bf16 %v2100_v18, %v2096_v15 }
  0x69   :  { %4229 = vmatpush1.bf16.msra.mxu0 %v4228_v50  ;;  %1671 = vmatprep.mubr.f32.mxu1 %v4532_v0  ;;  %v4938_v23 = vsub.f32 %v4741_v62, %v4915_v40  ;;  %v2191_v47 = vsub.f32 %v4902_v14, %v2190_v19  ;;  %v64_v14 = vld [vmem:[#allocation2 + $0xd0] sm:$0xff] }
  0x6a   :  { %4251 = vmatprep.subr.bf16.mxu1 %v4250_v30  ;;  %1274 = vmatprep.mubr.f32.mxu0 %v4532_v0  ;;  %v2684_v30 = vsub.f32 %v4928_v20, %v2683_v49 }
  0x6b   :  { %4231 = vmatprep.subr.bf16.mxu0 %v4230_v53  ;;  %1677 = vmatmul.mubr.f32.vlgmr.msra.gmra.mrb[2].mxu1 %v1676_v54  ;;  %v2167_v37 = vand.u32 4294901760, %v4938_v23  ;;  %v2192_v24 = vand.u32 4294901760, %v2191_v47  ;;  %v4987_v53 = vpack.c.bf16 %v2102_v61, %v2098_v57  ;;  %v4302_v57 = vpack.c.bf16 %v4928_v20, %v4926_v6 }
  0x6c   :  { %4253 = vmatpush1.bf16.msra.mxu1 %v4252_v55  ;;  %1767 = vmatprep.mubr.f32.mxu1 %v4532_v0  ;;  %v2685_v12 = vand.u32 4294901760, %v2684_v30  ;;  %v3088_v20 = vand.u32 4294901760, %v64_v14 }
  0x6d   :  { %4255 = vmatprep.subr.bf16.mxu1 %v4254_v59  ;;  %v2168_v39 = vsub.f32 %v4938_v23, %v2167_v37 }
  0x70   :  { %1276 = vmatmul.mubr.f32.vlgmr.msra.gmra.mrb[2].mxu0 %v4737_v60 }
  0x71   :  { %4233 = vmatpush1.bf16.msra.mxu0 %v4232_v4  ;;  %1354 = vmatprep.mubr.f32.mxu0 %v4532_v0 }
  0x72   :  { %4235 = vmatprep.subr.bf16.mxu0 %v4761_v5 }
  0x73   :  { %1769 = vmatmul.mubr.f32.vlgmr.msra.gmra.mrb[2].mxu1 %v4773_v7 }
  0x74   :  { %4257 = vmatpush1.bf16.msra.mxu1 %v4256_v63  ;;  %1847 = vmatprep.mubr.f32.mxu1 %v4532_v0 }
  0x75   :  { %4259 = vmatprep.subr.bf16.mxu1 %v4799_v16 }
  0x78   :  { %1357 = vmatmul.mubr.f32.vlgmr.msra.gmra.mrb[2].mxu0 %v4771_v21  ;;  %v2595_v21 = vand.u32 4294901760, %v4906_v42 }
  0x79   :  { %4237 = vmatpush1.bf16.msra.mxu0 %v4823_v43  ;;  %1431 = vmatprep.mubr.f32.mxu0 %v4532_v0 }
  0x7a   :  { %4239 = vmatprep.subr.bf16.mxu0 %v4238_v58  ;;  %v4948_v35 = vsub.f32 %v4906_v42, %v2595_v21  ;;  %v5007_v15 = vpack.c.bf16 %v2595_v21, %v2591_v44  ;;  %v4310_v42 = vpack.c.bf16 %v2683_v49, %v2671_v48  ;;  %v67_v21 = vld [vmem:[#allocation2 + $0xe8] sm:$0xff] }
  0x7b   :  { %1850 = vmatmul.mubr.f32.vlgmr.msra.gmra.mrb[2].mxu1 %v4803_v17  ;;  %v2184_v17 = vand.u32 4294901760, %v4919_v8 }
  0x7c   :  { %4261 = vmatpush1.bf16.msra.mxu1 %v4845_v29  ;;  %1924 = vmatprep.mubr.f32.mxu1 %v4532_v0  ;;  %v2689_v51 = vand.u32 4294901760, %v4948_v35 }
  0x7d   :  { %4263 = vmatprep.subr.bf16.mxu1 %v4262_v13  ;;  %v2185_v45 = vsub.f32 %v4919_v8, %v2184_v17 }
  0x7e   :  { %v2690_v63 = vsub.f32 %v4948_v35, %v2689_v51 }
  0x7f   :  { %v2186_v55 = vand.u32 4294901760, %v2185_v45  ;;  %v5054_v45 = vld [vmem:[#allocation2 + $0xe0] sm:$0xff] }
  0x80   :  { %1435 = vmatmul.mubr.f32.vlgmr.msra.gmra.mrb[2].mxu0 %v1181_v28  ;;  %v2178_v28 = vand.u32 4294901760, %v4900_v11  ;;  %v2691_v36 = vand.u32 4294901760, %v2690_v63 }
  0x81   :  { %4241 = vmatpush1.bf16.msra.mxu0 %v4240_v25  ;;  %1517 = vmatprep.mubr.f32.mxu0 %v4532_v0 }
  0x82   :  { %4243 = vmatprep.subr.bf16.mxu0 %v4761_v5  ;;  %v4945_v5 = vsub.f32 %v4904_v26, %v2591_v44  ;;  %v2179_v62 = vsub.f32 %v4900_v11, %v2178_v28  ;;  %v4286_v32 = vpack.c.bf16 %v2190_v19, %v2178_v28  ;;  %v65_v26 = vld [vmem:[#allocation2 + $0xd8] sm:$0xff]  ;;  %v5040_v11 = vld [vmem:[#allocation2 + $0xc0] sm:$0xff] }
  0x83   :  { %1928 = vmatmul.mubr.f32.vlgmr.msra.gmra.mrb[2].mxu1 %v1674_v22  ;;  %v2196_v22 = vand.u32 4294901760, %v4921_v10  ;;  %v3086_v44 = vand.u32 4294901760, %v65_v26  ;;  %v69_v28 = vld [vmem:[#allocation2 + $0xf8] sm:$0xff] }
  0x84   :  { %4265 = vmatpush1.bf16.msra.mxu1 %v4264_v38  ;;  %2010 = vmatprep.mubr.f32.mxu1 %v4532_v0  ;;  %v2677_v50 = vand.u32 4294901760, %v4945_v5  ;;  %v4304_v61 = vpack.c.bf16 %v4948_v35, %v4945_v5  ;;  %v3082_v38 = vand.u32 4294901760, %v63_v33  ;;  %v3579_v49 = vand.u32 4294901760, %v69_v28 }
  0x85   :  { %4267 = vmatprep.subr.bf16.mxu1 %v4799_v16  ;;  %v4967_v16 = vsub.f32 %v4777_v9, %v4941_v34  ;;  %v2197_v46 = vsub.f32 %v4921_v10, %v2196_v22  ;;  %v2180_v9 = vand.u32 4294901760, %v2179_v62  ;;  %v4288_v19 = vpack.c.bf16 %v2196_v22, %v2184_v17 }
  0x86   :  { %v2678_v4 = vsub.f32 %v4945_v5, %v2677_v50  ;;  %v5050_v62 = vsub.f32 %v63_v33, %v3082_v38  ;;  %v5052_v47 = vsub.f32 %v65_v26, %v3086_v44  ;;  %v5071_v22 = vsub.f32 %v64_v14, %v3088_v20 }
  0x87   :  { %v2660_v54 = vand.u32 4294901760, %v4967_v16  ;;  %v2198_v59 = vand.u32 4294901760, %v2197_v46  ;;  %v4274_v58 = vpack.c.bf16 %v2192_v24, %v2180_v9  ;;  %v5056_v46 = vld [vmem:[#allocation2 + $0xf0] sm:$0xff]  ;;  %v3577_v9 = vand.u32 4294901760, %v5054_v45 }
  0x88   :  { %1519 = vmatmul.mubr.f32.vlgmr.msra.gmra.mrb[2].mxu0 %v4737_v60  ;;  %v2679_v27 = vand.u32 4294901760, %v2678_v4  ;;  %v5078_v35 = vsub.f32 %v69_v28, %v3579_v49  ;;  %v4326_v14 = vpack.c.bf16 %v5052_v47, %v5050_v62 }
  0x89   :  { %4245 = vmatpush1.bf16.msra.mxu0 %v4823_v43  ;;  %1593 = vmatprep.mubr.f32.mxu0 %v4532_v0  ;;  %v2672_v43 = vsub.f32 %v4926_v6, %v2671_v48  ;;  %v2661_v13 = vsub.f32 %v4967_v16, %v2660_v54  ;;  %v4276_v18 = vpack.c.bf16 %v2198_v59, %v2186_v55  ;;  %v3084_v6 = vand.u32 4294901760, %v5040_v11 }
  0x8a   :  { %4271 = vmatprep.subr.bf16.mxu0 %v4934_v31  ;;  %v4300_v25 = vpack.c.bf16 %v2691_v36, %v2679_v27  ;;  %v3575_v48 = vand.u32 4294901760, %v67_v21  ;;  %v3669_v59 = vand.u32 4294901760, %v5078_v35 }
  0x8b   :  { %2012 = vmatmul.mubr.f32.vlgmr.msra.gmra.mrb[2].mxu1 %v4773_v7  ;;  %v2673_v3 = vand.u32 4294901760, %v2672_v43  ;;  %v5069_v17 = vsub.f32 %v5040_v11, %v3084_v6  ;;  %v5091_v43 = vand.u32 4294901760, %v4862_v56  ;;  %v5137_v27 = vpack.c.bf16 %v3088_v20, %v3084_v6 }
  0x8c   :  { %4269 = vmatpush1.bf16.msra.mxu1 %v4845_v29  ;;  %2086 = vmatprep.mubr.f32.mxu1 %v4532_v0  ;;  %v2169_v29 = vand.u32 4294901760, %v2168_v39  ;;  %v5076_v5 = vsub.f32 %v67_v21, %v3575_v48  ;;  %v3182_v39 = vand.u32 4294901760, %v5071_v22  ;;  %v5112_v4 = vpack.c.bf16 %v3579_v49, %v3575_v48 }
  0x8d   :  { %4295 = vmatprep.subr.bf16.mxu1 %v4962_v41  ;;  %v4298_v1 = vpack.c.bf16 %v2685_v12, %v2673_v3 }
  0x8e   :  { %v3657_v55 = vand.u32 4294901760, %v5076_v5  ;;  %v3183_v3 = vsub.f32 %v5071_v22, %v3182_v39  ;;  %v4350_v28 = vpack.c.bf16 %v5078_v35, %v5076_v5 }
  0x90   :  { %1595 = vmatmul.mubr.f32.vlgmr.msra.gmra.mrb[2].mxu0 %v4737_v60  ;;  %v2662_v60 = vand.u32 4294901760, %v2661_v13  ;;  %v4358_v20 = vpack.c.bf16 %v3669_v59, %v3657_v55 }
  0x91   :  { %4273 = vmatpush1.bf16.msra.mxu0 %v4987_v53  ;;  %2164 = vmatprep.mubr.f32.mxu0 %v4532_v0 }
  0x92   :  { %4275 = vmatprep.subr.bf16.mxu0 %v4274_v58 }
  0x93   :  { %2088 = vmatmul.mubr.f32.vlgmr.msra.gmra.mrb[2].mxu1 %v4773_v7  ;;  %v4280_v7 = vpack.c.bf16 %v4921_v10, %v4919_v8  ;;  %v4312_v8 = vpack.c.bf16 %v2689_v51, %v2677_v50  ;;  %v5065_v10 = vand.u32 4294901760, %v4853_v52  ;;  %v3176_v50 = vand.u32 4294901760, %v5052_v47 }
  0x94   :  { %2170 = vmatmul.mubr.f32.vlgmr.msra.gmra.mrb[4].mxu0 %v2169_v29  ;;  %4297 = vmatpush1.bf16.msra.mxu1 %v5007_v15  ;;  %v5084_v51 = vpack.c.bf16 %v3086_v44, %v3082_v38 }
  0x95   :  { %4277 = vmatpush1.bf16.msra.mxu0 %v4276_v18  ;;  %2657 = vmatprep.mubr.f32.mxu1 %v4532_v0  ;;  %v5088_v24 = vsub.f32 %v4853_v52, %v5065_v10  ;;  %v3670_v18 = vsub.f32 %v5078_v35, %v3669_v59 }
  0x96   :  { %4299 = vmatprep.subr.bf16.mxu1 %v4298_v1  ;;  %2260 = vmatprep.mubr.f32.mxu0 %v4532_v0 }
  0x97   :  { %4279 = vmatprep.subr.bf16.mxu0 %v4278_v2  ;;  %2663 = vmatmul.mubr.f32.vlgmr.msra.gmra.mrb[4].mxu1 %v2662_v60  ;;  %v3153_v63 = vand.u32 4294901760, %v5088_v24  ;;  %v3184_v60 = vand.u32 4294901760, %v3183_v3 }
  0x98   :  { %4301 = vmatpush1.bf16.msra.mxu1 %v4300_v25  ;;  %2753 = vmatprep.mubr.f32.mxu1 %v4532_v0 }
  0x99   :  { %4303 = vmatprep.subr.bf16.mxu1 %v4302_v57  ;;  %v3154_v36 = vsub.f32 %v5088_v24, %v3153_v63 }
  0x9c   :  { %2262 = vmatmul.mubr.f32.vlgmr.msra.gmra.mrb[4].mxu0 %v4915_v40 }
  0x9d   :  { %4281 = vmatpush1.bf16.msra.mxu0 %v4280_v7  ;;  %2340 = vmatprep.mubr.f32.mxu0 %v4532_v0 }
  0x9e   :  { %4283 = vmatprep.subr.bf16.mxu0 %v4934_v31 }
  0x9f   :  { %2755 = vmatmul.mubr.f32.vlgmr.msra.gmra.mrb[4].mxu1 %v4941_v34 }
  0xa0   :  { %4305 = vmatpush1.bf16.msra.mxu1 %v4304_v61  ;;  %2833 = vmatprep.mubr.f32.mxu1 %v4532_v0 }
  0xa1   :  { %4307 = vmatprep.subr.bf16.mxu1 %v4962_v41 }
  0xa4   :  { %2343 = vmatmul.mubr.f32.vlgmr.msra.gmra.mrb[4].mxu0 %v4938_v23  ;;  %v3581_v23 = vand.u32 4294901760, %v5056_v46 }
  0xa5   :  { %4285 = vmatpush1.bf16.msra.mxu0 %v4987_v53  ;;  %2417 = vmatprep.mubr.f32.mxu0 %v4532_v0 }
  0xa6   :  { %4287 = vmatprep.subr.bf16.mxu0 %v4286_v32  ;;  %v5098_v30 = vsub.f32 %v5056_v46, %v3581_v23  ;;  %v3671_v32 = vand.u32 4294901760, %v3670_v18  ;;  %v4344_v26 = vpack.c.bf16 %v3581_v23, %v3577_v9 }
  0xa7   :  { %2836 = vmatmul.mubr.f32.vlgmr.msra.gmra.mrb[4].mxu1 %v4967_v16  ;;  %v3170_v16 = vand.u32 4294901760, %v5069_v17 }
  0xa8   :  { %4309 = vmatpush1.bf16.msra.mxu1 %v5007_v15  ;;  %2910 = vmatprep.mubr.f32.mxu1 %v4532_v0  ;;  %v3675_v29 = vand.u32 4294901760, %v5098_v30 }
  0xa9   :  { %4311 = vmatprep.subr.bf16.mxu1 %v4310_v42  ;;  %v3171_v58 = vsub.f32 %v5069_v17, %v3170_v16 }
  0xaa   :  { %v3676_v57 = vsub.f32 %v5098_v30, %v3675_v29 }
  0xab   :  { %v3172_v2 = vand.u32 4294901760, %v3171_v58 }
  0xac   :  { %2421 = vmatmul.mubr.f32.vlgmr.msra.gmra.mrb[4].mxu0 %v2167_v37  ;;  %v3164_v37 = vand.u32 4294901760, %v5050_v62  ;;  %v3677_v44 = vand.u32 4294901760, %v3676_v57 }
  0xad   :  { %4289 = vmatpush1.bf16.msra.mxu0 %v4288_v19  ;;  %2503 = vmatprep.mubr.f32.mxu0 %v4532_v0  ;;  %v4324_v42 = vpack.c.bf16 %v3184_v60, %v3172_v2  ;;  %v4328_v19 = vpack.c.bf16 %v5071_v22, %v5069_v17 }
  0xae   :  { %4291 = vmatprep.subr.bf16.mxu0 %v4934_v31  ;;  %v5095_v31 = vsub.f32 %v5054_v45, %v3577_v9  ;;  %v3165_v52 = vsub.f32 %v5050_v62, %v3164_v37  ;;  %v4334_v6 = vpack.c.bf16 %v3176_v50, %v3164_v37  ;;  %v4336_v62 = vpack.c.bf16 %v3182_v39, %v3170_v16 }
  0xaf   :  { %2914 = vmatmul.mubr.f32.vlgmr.msra.gmra.mrb[4].mxu1 %v2660_v54  ;;  %v3177_v54 = vsub.f32 %v5052_v47, %v3176_v50 }
  0xb0   :  { %4313 = vmatpush1.bf16.msra.mxu1 %v4312_v8  ;;  %2996 = vmatprep.mubr.f32.mxu1 %v4532_v0  ;;  %v3663_v12 = vand.u32 4294901760, %v5095_v31 }
  0xb1   :  { %4315 = vmatprep.subr.bf16.mxu1 %v4962_v41  ;;  %v5117_v41 = vsub.f32 %v4862_v56, %v5091_v43  ;;  %v3166_v56 = vand.u32 4294901760, %v3165_v52  ;;  %v3178_v13 = vand.u32 4294901760, %v3177_v54 }
  0xb2   :  { %v3664_v25 = vsub.f32 %v5095_v31, %v3663_v12  ;;  %v4360_v47 = vpack.c.bf16 %v3675_v29, %v3663_v12 }
  0xb3   :  { %v3646_v1 = vand.u32 4294901760, %v5117_v41  ;;  %v4322_v7 = vpack.c.bf16 %v3178_v13, %v3166_v56 }
  0xb4   :  { %2505 = vmatmul.mubr.f32.vlgmr.msra.gmra.mrb[4].mxu0 %v4915_v40  ;;  %v3665_v38 = vand.u32 4294901760, %v3664_v25 }
  0xb5   :  { %4293 = vmatpush1.bf16.msra.mxu0 %v4987_v53  ;;  %2579 = vmatprep.mubr.f32.mxu0 %v4532_v0  ;;  %v3658_v53 = vsub.f32 %v5076_v5, %v3657_v55  ;;  %v3647_v33 = vsub.f32 %v5117_v41, %v3646_v1 }
  0xb6   :  { %4319 = vmatprep.subr.bf16.mxu0 %v5084_v51  ;;  %v4348_v21 = vpack.c.bf16 %v3677_v44, %v3665_v38 }
  0xb7   :  { %2998 = vmatmul.mubr.f32.vlgmr.msra.gmra.mrb[4].mxu1 %v4941_v34  ;;  %v3659_v61 = vand.u32 4294901760, %v3658_v53 }
  0xb8   :  { %4317 = vmatpush1.bf16.msra.mxu1 %v5007_v15  ;;  %3072 = vmatprep.mubr.f32.mxu1 %v4532_v0  ;;  %v3155_v15 = vand.u32 4294901760, %v3154_v36 }
  0xb9   :  { %4343 = vmatprep.subr.bf16.mxu1 %v5112_v4  ;;  %v4346_v11 = vpack.c.bf16 %v3671_v32, %v3659_v61 }
  0xbc   :  { %2581 = vmatmul.mubr.f32.vlgmr.msra.gmra.mrb[4].mxu0 %v4915_v40  ;;  %v3648_v40 = vand.u32 4294901760, %v3647_v33 }
  0xbd   :  { %4321 = vmatpush1.bf16.msra.mxu0 %v5137_v27  ;;  %3150 = vmatprep.mubr.f32.mxu0 %v4532_v0 }
  0xbe   :  { %4323 = vmatprep.subr.bf16.mxu0 %v4322_v7 }
  0xbf   :  { %3074 = vmatmul.mubr.f32.vlgmr.msra.gmra.mrb[4].mxu1 %v4941_v34  ;;  %v4352_v34 = vpack.c.bf16 %v5098_v30, %v5095_v31 }
  0xc0   :  { %3156 = vmatmul.mubr.f32.vlgmr.msra.gmra.mrb[6].mxu0 %v3155_v15  ;;  %4345 = vmatpush1.bf16.msra.mxu1 %v4344_v26 }
  0xc1   :  { %4325 = vmatpush1.bf16.msra.mxu0 %v4324_v42  ;;  %3643 = vmatprep.mubr.f32.mxu1 %v4532_v0 }
  0xc2   :  { %4347 = vmatprep.subr.bf16.mxu1 %v4346_v11  ;;  %3246 = vmatprep.mubr.f32.mxu0 %v4532_v0 }
  0xc3   :  { %4327 = vmatprep.subr.bf16.mxu0 %v4326_v14  ;;  %3649 = vmatmul.mubr.f32.vlgmr.msra.gmra.mrb[6].mxu1 %v3648_v40 }
  0xc4   :  { %4349 = vmatpush1.bf16.msra.mxu1 %v4348_v21  ;;  %3739 = vmatprep.mubr.f32.mxu1 %v4532_v0 }
  0xc5   :  { %4351 = vmatprep.subr.bf16.mxu1 %v4350_v28 }
  0xc8   :  { %3248 = vmatmul.mubr.f32.vlgmr.msra.gmra.mrb[6].mxu0 %v5065_v10 }
  0xc9   :  { %4329 = vmatpush1.bf16.msra.mxu0 %v4328_v19  ;;  %3326 = vmatprep.mubr.f32.mxu0 %v4532_v0 }
  0xca   :  { %4331 = vmatprep.subr.bf16.mxu0 %v5084_v51 }
  0xcb   :  { %3741 = vmatmul.mubr.f32.vlgmr.msra.gmra.mrb[6].mxu1 %v5091_v43 }
  0xcc   :  { %4353 = vmatpush1.bf16.msra.mxu1 %v4352_v34  ;;  %3819 = vmatprep.mubr.f32.mxu1 %v4532_v0 }
  0xcd   :  { %4355 = vmatprep.subr.bf16.mxu1 %v5112_v4 }
  0xcf   :  { %v4068_v48 = vpop.xlane.xlu0 %4067 }
  0xd0   :  { %3329 = vmatmul.mubr.f32.vlgmr.msra.gmra.mrb[6].mxu0 %v5088_v24  ;;  %v4069_v49 = vadd.f32 1.6e-07, %v4068_v48 }
  0xd1   :  { %4333 = vmatpush1.bf16.msra.mxu0 %v5137_v27  ;;  %3403 = vmatprep.mubr.f32.mxu0 %v4532_v0 }
  0xd2   :  { %4335 = vmatprep.subr.bf16.mxu0 %v4334_v6  ;;  %4454 = vrcp.f32 %v4069_v49 }
  0xd3   :  { %3822 = vmatmul.mubr.f32.vlgmr.msra.gmra.mrb[6].mxu1 %v5117_v41 }
  0xd4   :  { %4357 = vmatpush1.bf16.msra.mxu1 %v4344_v26  ;;  %3896 = vmatprep.mubr.f32.mxu1 %v4532_v0 }
  0xd5   :  { %4359 = vmatprep.subr.bf16.mxu1 %v4358_v20 }
  0xd8   :  { %3407 = vmatmul.mubr.f32.vlgmr.msra.gmra.mrb[6].mxu0 %v3153_v63 }
  0xd9   :  { %4337 = vmatpush1.bf16.msra.mxu0 %v4336_v62  ;;  %3489 = vmatprep.mubr.f32.mxu0 %v4532_v0 }
  0xda   :  { %4339 = vmatprep.subr.bf16.mxu0 %v5084_v51 }
  0xdb   :  { %3900 = vmatmul.mubr.f32.vlgmr.msra.gmra.mrb[6].mxu1 %v3646_v1 }
  0xdc   :  { %4361 = vmatpush1.bf16.msra.mxu1 %v4360_v47  ;;  %3982 = vmatprep.mubr.f32.mxu1 %v4532_v0  ;;  %v5212_v45 = vpop.eup %4454 }
  0xdd   :  { %4363 = vmatprep.subr.bf16.mxu1 %v5112_v4  ;;  %v4072_v17 = vrot.slane %v5212_v45, 1  ;;  %v4073_v24 = vrot.slane %v5212_v45, 2  ;;  %v4074_v16 = vrot.slane %v5212_v45, 3  ;;  %v4075_v13 = vrot.slane %v5212_v45, 4 }
  0xde   :  { %v4076_v36 = vrot.slane %v5212_v45, 5  ;;  %v4077_v44 = vrot.slane %v5212_v45, 6  ;;  %v4078_v19 = vrot.slane %v5212_v45, 7 }
  0xe0   :  { %3491 = vmatmul.mubr.f32.vlgmr.msra.gmra.mrb[6].mxu0 %v5065_v10 }
  0xe1   :  { %4341 = vmatpush1.bf16.msra.mxu0 %v5137_v27  ;;  %3565 = vmatprep.mubr.f32.mxu0 %v4532_v0 }
  0xe3   :  { %3984 = vmatmul.mubr.f32.vlgmr.msra.gmra.mrb[6].mxu1 %v5091_v43 }
  0xe4   :  { %4365 = vmatpush1.bf16.msra.mxu1 %v4344_v26  ;;  %4058 = vmatprep.mubr.f32.mxu1 %v4532_v0 }
  0xe8   :  { %3567 = vmatmul.mubr.f32.vlgmr.msra.gmra.mrb[6].mxu0 %v5065_v10 }
  0xeb   :  { %4060 = vmatmul.mubr.f32.vlgmr.msra.gmra.mrb[6].mxu1 %v5091_v43 }
 0x137   :  { %v610_v46 = vpop.f32.mrb[0].mxu0 }
 0x138   :  { %v612_v8 = vpop.f32.mrb[1].mxu0  ;;  %v4087_v0 = vmul.f32 %v5212_v45, %v610_v46 }
 0x139   :  { %v4088_v10 = vmul.f32 %v5212_v45, %v612_v8 }
 0x13a   :  { %v1103_v22 = vpop.f32.mrb[0].mxu1 }
 0x13b   :  { %v4089_v9 = vmul.f32 %v4072_v17, %v1103_v22  ;;  %v1105_v23 = vpop.f32.mrb[1].mxu1 }
 0x13c   :  { %v4090_v5 = vmul.f32 %v4072_v17, %v1105_v23 }
 0x13d   :  { %v4119_v35 = vrot.slane %v4089_v9, 7 }
 0x13e   :  { %v4140_v37 = vrot.slane %v4090_v5, 7 }
 0x13f   :  { %v4121_v50 = vsel %vm4120_vm1, %v4119_v35, %v4087_v0 }
 0x140   :  { %v4141_v51 = vsel %vm4120_vm1, %v4140_v37, %v4088_v10 }
 0x163   :  { %v1596_v43 = vpop.f32.mrb[2].mxu0 }
 0x164   :  { %v4091_v31 = vmul.f32 %v4073_v24, %v1596_v43  ;;  %v1598_v30 = vpop.f32.mrb[3].mxu0 }
 0x165   :  { %v4092_v39 = vmul.f32 %v4073_v24, %v1598_v30 }
 0x166   :  { %v4122_v52 = vrot.slane %v4091_v31, 6  ;;  %v2089_v55 = vpop.f32.mrb[2].mxu1 }
 0x167   :  { %v4142_v54 = vrot.slane %v4092_v39, 6  ;;  %v4093_v4 = vmul.f32 %v4074_v16, %v2089_v55  ;;  %v2091_v63 = vpop.f32.mrb[3].mxu1 }
 0x168   :  { %v4124_v59 = vsel %vm4123_vm2, %v4122_v52, %v4121_v50  ;;  %v4094_v58 = vmul.f32 %v4074_v16, %v2091_v63 }
 0x169   :  { %v4143_v41 = vsel %vm4123_vm2, %v4142_v54, %v4141_v51  ;;  %v4125_v3 = vrot.slane %v4093_v4, 5 }
 0x16a   :  { %v4144_v12 = vrot.slane %v4094_v58, 5 }
 0x16b   :  { %v4127_v29 = vsel %vm4126_vm3, %v4125_v3, %v4124_v59 }
 0x16c   :  { %v4145_v56 = vsel %vm4126_vm3, %v4144_v12, %v4143_v41 }
 0x18f   :  { %v2582_v53 = vpop.f32.mrb[4].mxu0 }
 0x190   :  { %v4095_v18 = vmul.f32 %v4075_v13, %v2582_v53  ;;  %v2584_v27 = vpop.f32.mrb[5].mxu0 }
 0x191   :  { %v4096_v1 = vmul.f32 %v4075_v13, %v2584_v27 }
 0x192   :  { %v4128_v2 = vrot.slane %v4095_v18, 4  ;;  %v3075_v25 = vpop.f32.mrb[4].mxu1 }
 0x193   :  { %v4146_v60 = vrot.slane %v4096_v1, 4  ;;  %v4097_v7 = vmul.f32 %v4076_v36, %v3075_v25  ;;  %v3077_v61 = vpop.f32.mrb[5].mxu1 }
 0x194   :  { %v4130_v57 = vsel %vm4129_vm4, %v4128_v2, %v4127_v29  ;;  %v4098_v15 = vmul.f32 %v4076_v36, %v3077_v61 }
 0x195   :  { %v4147_v32 = vsel %vm4129_vm4, %v4146_v60, %v4145_v56  ;;  %v4131_v33 = vrot.slane %v4097_v7, 3 }
 0x196   :  { %v4148_v26 = vrot.slane %v4098_v15, 3 }
 0x197   :  { %v4133_v42 = vsel %vm4132_vm5, %v4131_v33, %v4130_v57 }
 0x198   :  { %v4149_v38 = vsel %vm4132_vm5, %v4148_v26, %v4147_v32 }
 0x1bb   :  { %v3568_v11 = vpop.f32.mrb[6].mxu0 }
 0x1bc   :  { %v4099_v14 = vmul.f32 %v4077_v44, %v3568_v11  ;;  %v3570_v40 = vpop.f32.mrb[7].mxu0 }
 0x1bd   :  { %v4100_v21 = vmul.f32 %v4077_v44, %v3570_v40 }
 0x1be   :  { %v4134_v28 = vrot.slane %v4099_v14, 2  ;;  %v4061_v6 = vpop.f32.mrb[6].mxu1 }
 0x1bf   :  { %v4150_v34 = vrot.slane %v4100_v21, 2  ;;  %v4101_v62 = vmul.f32 %v4078_v19, %v4061_v6  ;;  %v4063_v47 = vpop.f32.mrb[7].mxu1 }
 0x1c0   :  { %v4136_v20 = vsel %vm4135_vm6, %v4134_v28, %v4133_v42  ;;  %v4102_v49 = vmul.f32 %v4078_v19, %v4063_v47 }
 0x1c1   :  { %v4151_v48 = vsel %vm4135_vm6, %v4150_v34, %v4149_v38  ;;  %v4137_v46 = vrot.slane %v4101_v62, 1 }
 0x1c2   :  { %v4152_v8 = vrot.slane %v4102_v49, 1 }
 0x1c3   :  { %v4139_v17 = vsel %vm4138_vm7, %v4137_v46, %v4136_v20 }
 0x1c4   :  { %v4153_v22 = vsel %vm4138_vm7, %v4152_v8, %v4151_v48  ;;  %4156 = vst [vmem:[#allocation7] sm:$0xff] %v4139_v17 }
 0x1c5   :  { %4157 = vst [vmem:[#allocation7 + $0x8] sm:$0xff] %v4153_v22 }
 0x1c6   :  { %4511 = shalt.err (!%p4508_p6)
}
 0x1c7   :  { %s4512_s10 = scalar_lea.hbm %s5237_s2, 256 }
 0x1c8   :  { %p4513_p7 = scmp.ne.s32.totalorder %s5237_s2, %s4512_s10  ;;  %p4516_p8 = scmp.lt.u32.totalorder %s4512_s10, %s5237_s2 }
 0x1ca   :  { %p4518_p9 = pnand %p4516_p8, %p4513_p7 }
 0x1cc   :  { %4521 = shalt.err (!%p4518_p9)
}
 0x1cd   :  { %4167 = dma.vmem_to_hbm [thread:$0]  %s4165_s6, 256, %s5237_s2, [#allocation4]  }
 0x1ce   :  { %4526 = dma.done.wait [#allocation4], 256  }
 0x1cf   :  { %4527 = vsyncadd [#allocation4], 4294967040 }
 0x1d0   :  { %4171 = vsyncpa [#allocation3], 1 }
 0x1d1   :  { %4172 = vsyncpa [#allocation6], 1 }
 0x1d2   :  { %4173 = vsyncpa [#allocation4], 1 }

</bundles_post_ra>
